<compile_context>
chip_gen: v7x
topology: tpu7x:2x2x1
jax: 0.10.0
libtpu: 0.0.40
codegen_flags: <defaults>
</compile_context>

<pallas_src>
import numpy as np
import jax
import jax.numpy as jnp
from jax.experimental import pallas as pl
from jax.experimental.pallas import tpu as pltpu


def _round_up(x, m):
    return ((int(x) + m - 1) // m) * m


# ----------------------------------------------------------------------------
# Pallas kernel: fused per-point MLP (2x matmul+ReLU) + max over point slots.
# ----------------------------------------------------------------------------
def _pillar_mlp_pool_kernel(feat_ref,   # (P_blk, C1, TM) bf16  point slots of a tile
                            w1t_ref,    # (H1, C1)        bf16  folded conv1^T (+bias)
                            w2t_ref,    # (C_out, H1)     bf16  folded conv2^T (+bias)
                            out_ref):   # (C_out, TM)     f32   resident across pb
    pb = pl.program_id(1)

    @pl.when(pb == 0)
    def _():
        # scatter-max identity: 0 is valid because the MLP output is post-ReLU
        # (>= 0) and padded slots/pillars produce exactly 0 (zero indicator).
        out_ref[...] = jnp.zeros_like(out_ref)

    w1t = w1t_ref[...]
    w2t = w2t_ref[...]
    best = out_ref[...]                               # (C_out, TM) f32
    p_blk = feat_ref.shape[0]
    for p in range(p_blk):                            # static unroll, small
        xp = feat_ref[p]                              # (C1, TM) bf16
        h = jnp.maximum(
            jnp.dot(w1t, xp, preferred_element_type=jnp.float32), 0.0)
        y = jnp.maximum(
            jnp.dot(w2t, h.astype(w2t.dtype),
                    preferred_element_type=jnp.float32), 0.0)
        best = jnp.maximum(best, y)
    out_ref[...] = best


def pillar_max_pool(dense, w1t, w2t, *, tm, p_blk):
    """dense: (P_pad, C1, M_pad) bf16 lane-dense pillar layout -> (C_out, M_pad) f32."""
    P_pad, C1, M_pad = dense.shape
    H1, C1w = w1t.shape
    C_out, H1w = w2t.shape
    assert C1w == C1 and H1w == H1
    assert M_pad % tm == 0 and tm % 128 == 0 and P_pad % p_blk == 0
    n_tiles = M_pad // tm
    n_pblocks = P_pad // p_blk

    cost = pl.CostEstimate(
        flops=2 * P_pad * M_pad * (C1 * H1 + H1 * C_out),
        transcendentals=0,
        bytes_accessed=2 * P_pad * C1 * M_pad + 4 * C_out * M_pad
                       + 2 * (H1 * C1 + C_out * H1),
    )

    grid_spec = pltpu.PrefetchScalarGridSpec(
        num_scalar_prefetch=0,
        grid=(n_tiles, n_pblocks),                    # pillar tiles x slot blocks
        in_specs=[
            pl.BlockSpec((p_blk, C1, tm), lambda i, pb: (pb, 0, i)),
            pl.BlockSpec((H1, C1), lambda i, pb: (0, 0)),
            pl.BlockSpec((C_out, H1), lambda i, pb: (0, 0)),
        ],
        out_specs=pl.BlockSpec((C_out, tm), lambda i, pb: (0, i)),
    )

    return pl.pallas_call(
        _pillar_mlp_pool_kernel,
        out_shape=jax.ShapeDtypeStruct((C_out, M_pad), jnp.float32),
        grid_spec=grid_spec,
        compiler_params=pltpu.CompilerParams(
            dimension_semantics=("parallel", "arbitrary"),
            # 48 MiB: < v7x 64 MiB physical VMEM, ample headroom on v5e/v6e (128 MiB)
            vmem_limit_bytes=48 * 1024 * 1024,
        ),
        cost_estimate=cost,
    )(dense, w1t, w2t)


# ----------------------------------------------------------------------------
# Host-side glue: PillarQueryAndGroupV2a (voxelization / grouping / dense layout)
# ----------------------------------------------------------------------------
def bev_spatial_shape(point_cloud_range, bev_size):
    W = int(round((point_cloud_range[3] - point_cloud_range[0]) / bev_size))
    H = int(round((point_cloud_range[4] - point_cloud_range[1]) / bev_size))
    return W, H


def pillar_query_and_group_dense(xyz, xyz_batch_cnt, point_features, bev_size,
                                 point_cloud_range, tile_pillars=1024,
                                 point_block=32, max_points_per_pillar=None):
    # TODO(synk): exact feature layout of the CUDA PillarQueryAndGroupV2a op is not
    # in the provided source; using [rel_x, rel_y, z, point_features] with
    # out-of-range points clipped into boundary pillars.
    xyz = np.asarray(xyz, np.float32)
    pf = np.asarray(point_features, np.float32)
    cnts = np.asarray(xyz_batch_cnt)
    W, H = bev_spatial_shape(point_cloud_range, bev_size)
    x_min, y_min = point_cloud_range[0], point_cloud_range[1]
    N = xyz.shape[0]

    px = np.clip(np.floor((xyz[:, 0] - x_min) / bev_size).astype(np.int64), 0, W - 1)
    py = np.clip(np.floor((xyz[:, 1] - y_min) / bev_size).astype(np.int64), 0, H - 1)
    bid = np.repeat(np.arange(cnts.shape[0]), cnts)

    keys = bid * (H * W) + py * W + px
    uniq, inv = np.unique(keys, return_inverse=True)
    inv = inv.reshape(-1).astype(np.int64)
    M = int(uniq.shape[0])
    pillar_indices = np.stack(
        [uniq // (H * W), (uniq % (H * W)) // W, uniq % W], axis=-1
    ).astype(np.int32)                                   # (M, 3) [b, y, x]
    pillar_set_indices = inv.astype(np.int32)            # (N,)

    # per-point grouped features (pillar-center relative xy, z, raw features)
    cx = x_min + (px.astype(np.float32) + 0.5) * bev_size
    cy = y_min + (py.astype(np.float32) + 0.5) * bev_size
    rel = np.stack([xyz[:, 0] - cx, xyz[:, 1] - cy, xyz[:, 2]], axis=-1)
    group_features = np.concatenate([rel, pf], axis=-1).astype(np.float32)  # (N,C_in)
    C_in = group_features.shape[1]

    # per-pillar point ranks
    counts = np.bincount(inv, minlength=M)
    order = np.argsort(inv, kind="stable")
    starts = np.concatenate([[0], np.cumsum(counts)[:-1]])
    ranks = np.empty(N, np.int64)
    ranks[order] = np.arange(N) - np.repeat(starts, counts)

    P = int(counts.max())
    if max_points_per_pillar is not None:
        # TODO(synk): capping occupancy drops points and changes semantics vs the
        # CUDA op (which has no cap); gated behind this explicit flag (default off).
        P = min(P, int(max_points_per_pillar))
    keep = ranks < P

    # block-size adaptation (P_pad divisible by p_blk, M_pad by TM, TM % 128 == 0)
    P_pad = _round_up(P, 8)
    p_blk = 1
    for cand in range(min(int(point_block), P_pad), 0, -1):
        if P_pad % cand == 0:
            p_blk = cand
            break
    tile_pillars = _round_up(tile_pillars, 128)
    TM = max(128, min(tile_pillars, _round_up(M, 128)))
    M_pad = _round_up(M, TM)

    # Lane-dense dense layout: (point_slot, channel, pillar).  The trailing
    # homogeneous "indicator" channel carries the folded BN bias and keeps padded
    # slots/pillars at exactly 0 through both ReLUs (scatter-max zero identity).
    dense = np.zeros((P_pad, C_in + 1, M_pad), np.float32)
    dense[ranks[keep], :C_in, inv[keep]] = group_features[keep]
    dense[ranks[keep], C_in, inv[keep]] = 1.0
    dense = dense.astype(jnp.bfloat16)                   # halve HBM / H2D traffic

    return (pillar_indices, pillar_set_indices, group_features, dense,
            M, M_pad, TM, P_pad, p_blk, H, W)


def fold_params(params, eps=1e-5):
    """Fold eval-mode BN (gamma, beta, running mean/var) into the conv weights,
    biases via a homogeneous indicator column; return transposed bf16 weights."""
    w1 = np.asarray(params["w1"], np.float32)
    w2 = np.asarray(params["w2"], np.float32)
    g1 = np.asarray(params["gamma1"], np.float32).reshape(-1)
    b1 = np.asarray(params["beta1"], np.float32).reshape(-1)
    m1 = np.asarray(params["mean1"], np.float32).reshape(-1)
    v1 = np.asarray(params["var1"], np.float32).reshape(-1)
    g2 = np.asarray(params["gamma2"], np.float32).reshape(-1)
    b2 = np.asarray(params["beta2"], np.float32).reshape(-1)
    m2 = np.asarray(params["mean2"], np.float32).reshape(-1)
    v2 = np.asarray(params["var2"], np.float32).reshape(-1)

    s1 = g1 / np.sqrt(v1 + eps)
    c1 = b1 - m1 * s1
    s2 = g2 / np.sqrt(v2 + eps)
    c2 = b2 - m2 * s2

    C_in, C_h = w1.shape
    C_out = w2.shape[1]
    W1 = np.zeros((C_in + 1, C_h + 1), np.float32)
    W1[:C_in, :C_h] = w1 * s1
    W1[C_in, :C_h] = c1
    W1[C_in, C_h] = 1.0                                  # carry indicator through
    W2 = np.zeros((C_h + 1, C_out), np.float32)
    W2[:C_h, :] = w2 * s2
    W2[C_h, :] = c2

    w1t = jnp.asarray(np.ascontiguousarray(W1.T).astype(jnp.bfloat16))  # (H1, C1)
    w2t = jnp.asarray(np.ascontiguousarray(W2.T).astype(jnp.bfloat16))  # (C_out, H1)
    return w1t, w2t


# ----------------------------------------------------------------------------
# Full module forward
# ----------------------------------------------------------------------------
def pillar_max_pooling_v2a_forward(xyz, xyz_batch_cnt, point_features, params,
                                   bev_size, point_cloud_range,
                                   tile_pillars=1024, point_block=32,
                                   max_points_per_pillar=None, bn_eps=1e-5):
    B = int(np.asarray(xyz_batch_cnt).shape[0])
    W, H = bev_spatial_shape(point_cloud_range, bev_size)
    C_out = int(np.asarray(params["w2"]).shape[1])
    N = int(np.asarray(xyz).shape[0])
    if N == 0:                                           # empty-scene guard
        return (jnp.zeros((0, C_out), jnp.float32),
                jnp.zeros((0, 3), jnp.int32), (H, W), B)

    (pillar_indices, _psi, _gf, dense, M, _M_pad, TM, _P_pad, p_blk, H, W) = \
        pillar_query_and_group_dense(xyz, xyz_batch_cnt, point_features, bev_size,
                                     point_cloud_range, tile_pillars, point_block,
                                     max_points_per_pillar)
    w1t, w2t = fold_params(params, bn_eps)
    out = pillar_max_pool(jnp.asarray(dense), w1t, w2t, tm=TM, p_blk=p_blk)
    pillar_features = out[:, :M].T                       # (M, C_out), cheap XLA op
    # TODO(synk): spconv.SparseConvTensor has no Pallas/JAX equivalent; return its
    # constituent fields as a tuple.
    return pillar_features, jnp.asarray(pillar_indices), (H, W), B


# ----------------------------------------------------------------------------
# Deterministic parameter init (xavier_normal conv weights, nontrivial BN stats)
# ----------------------------------------------------------------------------
def init_params(mlps, key):
    c_in, c_h, c_out = mlps
    ks = jax.random.split(key, 10)
    std1 = float(np.sqrt(2.0 / (c_in + c_h)))
    std2 = float(np.sqrt(2.0 / (c_h + c_out)))
    return {
        "w1": jax.random.normal(ks[0], (c_in, c_h), jnp.float32) * std1,
        "w2": jax.random.normal(ks[1], (c_h, c_out), jnp.float32) * std2,
        "gamma1": jax.random.uniform(ks[2], (c_h,), jnp.float32, 0.7, 1.3),
        "beta1": 0.1 * jax.random.normal(ks[3], (c_h,), jnp.float32),
        "mean1": 0.2 * jax.random.normal(ks[4], (c_h,), jnp.float32),
        "var1": jax.random.uniform(ks[5], (c_h,), jnp.float32, 0.5, 1.5),
        "gamma2": jax.random.uniform(ks[6], (c_out,), jnp.float32, 0.7, 1.3),
        "beta2": 0.1 * jax.random.normal(ks[7], (c_out,), jnp.float32),
        "mean2": 0.2 * jax.random.normal(ks[8], (c_out,), jnp.float32),
        "var2": jax.random.uniform(ks[9], (c_out,), jnp.float32, 0.5, 1.5),
    }


# ----------------------------------------------------------------------------
# Reference (numpy) for verification: unfused MLP + eval BN + scatter_max
# ----------------------------------------------------------------------------
def reference(group_features, pillar_set_indices, M, params, eps=1e-5):
    g = np.asarray(group_features, np.float32)
    w1 = np.asarray(params["w1"], np.float32)
    w2 = np.asarray(params["w2"], np.float32)
    s1 = np.asarray(params["gamma1"]) / np.sqrt(np.asarray(params["var1"]) + eps)
    c1 = np.asarray(params["beta1"]) - np.asarray(params["mean1"]) * s1
    s2 = np.asarray(params["gamma2"]) / np.sqrt(np.asarray(params["var2"]) + eps)
    c2 = np.asarray(params["beta2"]) - np.asarray(params["mean2"]) * s2
    h = np.maximum(g @ w1 * s1 + c1, 0.0)
    y = np.maximum(h @ w2 * s2 + c2, 0.0)
    out = np.zeros((M, y.shape[1]), np.float32)
    np.maximum.at(out, np.asarray(pillar_set_indices), y)
    return out


if __name__ == "__main__":
    key = jax.random.PRNGKey(0)

    def run_case(case_key, batch_counts, pcr, bev_size, C_pts, mlps,
                 tile_pillars, point_block):
        k_xy, k_z, k_pf, k_par = jax.random.split(case_key, 4)
        xyz_batch_cnt = np.asarray(batch_counts, np.int32)
        N = int(xyz_batch_cnt.sum())
        xy = jax.random.uniform(k_xy, (N, 2), jnp.float32, pcr[0] + 0.1, pcr[3] - 0.1)
        z = jax.random.uniform(k_z, (N, 1), jnp.float32, pcr[2] + 0.2, pcr[5] - 0.2)
        xyz = jnp.concatenate([xy, z], axis=-1)                     # (N, 3)
        point_features = jax.random.normal(k_pf, (N, C_pts), jnp.float32)
        params = init_params(mlps, k_par)

        feats, p_idx, _spatial, _B = pillar_max_pooling_v2a_forward(
            xyz, xyz_batch_cnt, point_features, params, bev_size, pcr,
            tile_pillars=tile_pillars, point_block=point_block)
        feats = jax.block_until_ready(feats)

        pi, psi, gf, *_rest = pillar_query_and_group_dense(
            xyz, xyz_batch_cnt, point_features, bev_size, pcr,
            tile_pillars=tile_pillars, point_block=point_block)
        M = pi.shape[0]
        ref = reference(gf, psi, M, params)
        assert feats.shape == (M, mlps[-1]) and p_idx.shape == (M, 3)
        # bf16 features/weights -> loosened tolerance (f32 reference)
        np.testing.assert_allclose(np.asarray(feats), ref, rtol=3e-2, atol=3e-2)

    k1, k2 = jax.random.split(key)
    # small scene: single pillar tile, single point-slot block
    run_case(k1, [48, 52], [0.0, 0.0, -3.0, 8.0, 8.0, 1.0], 1.0,
             5, [8, 16, 32], tile_pillars=1024, point_block=32)
    # moderate scene: multiple pillar tiles and multiple point-slot blocks
    run_case(k2, [2000, 2000], [0.0, 0.0, -3.0, 20.0, 20.0, 1.0], 0.5,
             5, [8, 16, 32], tile_pillars=256, point_block=4)

    print("KERNEL_OK")
</pallas_src>

<mosaic_0001>
module attributes {stable_mosaic.version = 11 : i64} {
  func.func @_pillar_mlp_pool_kernel(%arg0: i32, %arg1: i32, %arg2: memref<8x9x128xbf16, #tpu.memory_space<vmem>>, %arg3: memref<17x9xbf16, #tpu.memory_space<vmem>>, %arg4: memref<32x17xbf16, #tpu.memory_space<vmem>>, %arg5: memref<32x128xf32, #tpu.memory_space<vmem>>) attributes {dimension_semantics = [#tpu.dimension_semantics<parallel>, #tpu.dimension_semantics<arbitrary>], iteration_bounds = array<i64: 1, 1>, scalar_prefetch = 0 : i64, scratch_operands = 0 : i64, tpu.core_type = #tpu.core_type<tc>, window_params = [{transform_indices = @transform_0, window_bounds = array<i64: 8, 9, 128>}, {pipeline_mode = #tpu.pipeline_mode<synchronous>, transform_indices = @transform_1, window_bounds = array<i64: 17, 9>}, {pipeline_mode = #tpu.pipeline_mode<synchronous>, transform_indices = @transform_2, window_bounds = array<i64: 32, 17>}, {transform_indices = @transform_3, window_bounds = array<i64: 32, 128>}]} {
    %c0_i32 = arith.constant 0 : i32
    %0 = arith.cmpi eq, %arg1, %c0_i32 : i32
    %1 = arith.extui %0 : i1 to i32
    %c0_i32_0 = arith.constant 0 : i32
    %2 = arith.cmpi ne, %1, %c0_i32_0 : i32
    scf.if %2 {
      %cst_56 = arith.constant 0.000000e+00 : f32
      %87 = vector.broadcast %cst_56 : f32 to vector<32x128xf32>
      %c0_57 = arith.constant 0 : index
      %c0_58 = arith.constant 0 : index
      %88 = vector.load %arg5[%c0_57, %c0_58] : memref<32x128xf32, #tpu.memory_space<vmem>>, vector<32x128xf32>
      tpu.vector_store %arg5[%c0_57, %c0_58], %87 {strides = array<i32>} : memref<32x128xf32, #tpu.memory_space<vmem>>, vector<32x128xf32>,
    } else {
    }
    %c0 = arith.constant 0 : index
    %c0_1 = arith.constant 0 : index
    %3 = vector.load %arg3[%c0, %c0_1] : memref<17x9xbf16, #tpu.memory_space<vmem>>, vector<17x9xbf16>
    %c0_2 = arith.constant 0 : index
    %c0_3 = arith.constant 0 : index
    %4 = vector.load %arg4[%c0_2, %c0_3] : memref<32x17xbf16, #tpu.memory_space<vmem>>, vector<32x17xbf16>
    %c0_4 = arith.constant 0 : index
    %c0_5 = arith.constant 0 : index
    %5 = vector.load %arg5[%c0_4, %c0_5] : memref<32x128xf32, #tpu.memory_space<vmem>>, vector<32x128xf32>
    %c0_6 = arith.constant 0 : index
    %c0_7 = arith.constant 0 : index
    %c0_8 = arith.constant 0 : index
    %6 = vector.load %arg2[%c0_6, %c0_7, %c0_8] : memref<8x9x128xbf16, #tpu.memory_space<vmem>>, vector<1x9x128xbf16>
    %7 = vector.shape_cast %6 : vector<1x9x128xbf16> to vector<9x128xbf16>
    %cst = arith.constant dense<0.000000e+00> : vector<17x128xf32>
    %8 = tpu.matmul %3, %7, %cst {dimension_numbers = #tpu.dot_dimension_numbers<[1], [0], [0], [1], [0, 0, 1, 1], [], []>} : vector<17x9xbf16>, vector<9x128xbf16>, vector<17x128xf32> -> vector<17x128xf32>
    %cst_9 = arith.constant 0.000000e+00 : f32
    %9 = vector.broadcast %cst_9 : f32 to vector<17x128xf32>
    %10 = arith.maximumf %8, %9 : vector<17x128xf32>
    %11 = arith.truncf %10 : vector<17x128xf32> to vector<17x128xbf16>
    %cst_10 = arith.constant dense<0.000000e+00> : vector<32x128xf32>
    %12 = tpu.matmul %4, %11, %cst_10 {dimension_numbers = #tpu.dot_dimension_numbers<[1], [0], [0], [1], [0, 0, 1, 1], [], []>} : vector<32x17xbf16>, vector<17x128xbf16>, vector<32x128xf32> -> vector<32x128xf32>
    %cst_11 = arith.constant 0.000000e+00 : f32
    %13 = vector.broadcast %cst_11 : f32 to vector<32x128xf32>
    %14 = arith.maximumf %12, %13 : vector<32x128xf32>
    %15 = arith.maximumf %5, %14 : vector<32x128xf32>
    %c1 = arith.constant 1 : index
    %c0_12 = arith.constant 0 : index
    %c0_13 = arith.constant 0 : index
    %16 = vector.load %arg2[%c1, %c0_12, %c0_13] : memref<8x9x128xbf16, #tpu.memory_space<vmem>>, vector<1x9x128xbf16>
    %17 = vector.shape_cast %16 : vector<1x9x128xbf16> to vector<9x128xbf16>
    %cst_14 = arith.constant dense<0.000000e+00> : vector<17x128xf32>
    %18 = tpu.matmul %3, %17, %cst_14 {dimension_numbers = #tpu.dot_dimension_numbers<[1], [0], [0], [1], [0, 0, 1, 1], [], []>} : vector<17x9xbf16>, vector<9x128xbf16>, vector<17x128xf32> -> vector<17x128xf32>
    %cst_15 = arith.constant 0.000000e+00 : f32
    %19 = vector.broadcast %cst_15 : f32 to vector<17x128xf32>
    %20 = arith.maximumf %18, %19 : vector<17x128xf32>
    %21 = arith.truncf %20 : vector<17x128xf32> to vector<17x128xbf16>
    %cst_16 = arith.constant dense<0.000000e+00> : vector<32x128xf32>
    %22 = tpu.matmul %4, %21, %cst_16 {dimension_numbers = #tpu.dot_dimension_numbers<[1], [0], [0], [1], [0, 0, 1, 1], [], []>} : vector<32x17xbf16>, vector<17x128xbf16>, vector<32x128xf32> -> vector<32x128xf32>
    %cst_17 = arith.constant 0.000000e+00 : f32
    %23 = vector.broadcast %cst_17 : f32 to vector<32x128xf32>
    %24 = arith.maximumf %22, %23 : vector<32x128xf32>
    %25 = arith.maximumf %15, %24 : vector<32x128xf32>
    %c2 = arith.constant 2 : index
    %c0_18 = arith.constant 0 : index
    %c0_19 = arith.constant 0 : index
    %26 = vector.load %arg2[%c2, %c0_18, %c0_19] : memref<8x9x128xbf16, #tpu.memory_space<vmem>>, vector<1x9x128xbf16>
    %27 = vector.shape_cast %26 : vector<1x9x128xbf16> to vector<9x128xbf16>
    %cst_20 = arith.constant dense<0.000000e+00> : vector<17x128xf32>
    %28 = tpu.matmul %3, %27, %cst_20 {dimension_numbers = #tpu.dot_dimension_numbers<[1], [0], [0], [1], [0, 0, 1, 1], [], []>} : vector<17x9xbf16>, vector<9x128xbf16>, vector<17x128xf32> -> vector<17x128xf32>
    %cst_21 = arith.constant 0.000000e+00 : f32
    %29 = vector.broadcast %cst_21 : f32 to vector<17x128xf32>
    %30 = arith.maximumf %28, %29 : vector<17x128xf32>
    %31 = arith.truncf %30 : vector<17x128xf32> to vector<17x128xbf16>
    %cst_22 = arith.constant dense<0.000000e+00> : vector<32x128xf32>
    %32 = tpu.matmul %4, %31, %cst_22 {dimension_numbers = #tpu.dot_dimension_numbers<[1], [0], [0], [1], [0, 0, 1, 1], [], []>} : vector<32x17xbf16>, vector<17x128xbf16>, vector<32x128xf32> -> vector<32x128xf32>
    %cst_23 = arith.constant 0.000000e+00 : f32
    %33 = vector.broadcast %cst_23 : f32 to vector<32x128xf32>
    %34 = arith.maximumf %32, %33 : vector<32x128xf32>
    %35 = arith.maximumf %25, %34 : vector<32x128xf32>
    %c3 = arith.constant 3 : index
    %c0_24 = arith.constant 0 : index
    %c0_25 = arith.constant 0 : index
    %36 = vector.load %arg2[%c3, %c0_24, %c0_25] : memref<8x9x128xbf16, #tpu.memory_space<vmem>>, vector<1x9x128xbf16>
    %37 = vector.shape_cast %36 : vector<1x9x128xbf16> to vector<9x128xbf16>
    %cst_26 = arith.constant dense<0.000000e+00> : vector<17x128xf32>
    %38 = tpu.matmul %3, %37, %cst_26 {dimension_numbers = #tpu.dot_dimension_numbers<[1], [0], [0], [1], [0, 0, 1, 1], [], []>} : vector<17x9xbf16>, vector<9x128xbf16>, vector<17x128xf32> -> vector<17x128xf32>
    %cst_27 = arith.constant 0.000000e+00 : f32
    %39 = vector.broadcast %cst_27 : f32 to vector<17x128xf32>
    %40 = arith.maximumf %38, %39 : vector<17x128xf32>
    %41 = arith.truncf %40 : vector<17x128xf32> to vector<17x128xbf16>
    %cst_28 = arith.constant dense<0.000000e+00> : vector<32x128xf32>
    %42 = tpu.matmul %4, %41, %cst_28 {dimension_numbers = #tpu.dot_dimension_numbers<[1], [0], [0], [1], [0, 0, 1, 1], [], []>} : vector<32x17xbf16>, vector<17x128xbf16>, vector<32x128xf32> -> vector<32x128xf32>
    %cst_29 = arith.constant 0.000000e+00 : f32
    %43 = vector.broadcast %cst_29 : f32 to vector<32x128xf32>
    %44 = arith.maximumf %42, %43 : vector<32x128xf32>
    %45 = arith.maximumf %35, %44 : vector<32x128xf32>
    %c4 = arith.constant 4 : index
    %c0_30 = arith.constant 0 : index
    %c0_31 = arith.constant 0 : index
    %46 = vector.load %arg2[%c4, %c0_30, %c0_31] : memref<8x9x128xbf16, #tpu.memory_space<vmem>>, vector<1x9x128xbf16>
    %47 = vector.shape_cast %46 : vector<1x9x128xbf16> to vector<9x128xbf16>
    %cst_32 = arith.constant dense<0.000000e+00> : vector<17x128xf32>
    %48 = tpu.matmul %3, %47, %cst_32 {dimension_numbers = #tpu.dot_dimension_numbers<[1], [0], [0], [1], [0, 0, 1, 1], [], []>} : vector<17x9xbf16>, vector<9x128xbf16>, vector<17x128xf32> -> vector<17x128xf32>
    %cst_33 = arith.constant 0.000000e+00 : f32
    %49 = vector.broadcast %cst_33 : f32 to vector<17x128xf32>
    %50 = arith.maximumf %48, %49 : vector<17x128xf32>
    %51 = arith.truncf %50 : vector<17x128xf32> to vector<17x128xbf16>
    %cst_34 = arith.constant dense<0.000000e+00> : vector<32x128xf32>
    %52 = tpu.matmul %4, %51, %cst_34 {dimension_numbers = #tpu.dot_dimension_numbers<[1], [0], [0], [1], [0, 0, 1, 1], [], []>} : vector<32x17xbf16>, vector<17x128xbf16>, vector<32x128xf32> -> vector<32x128xf32>
    %cst_35 = arith.constant 0.000000e+00 : f32
    %53 = vector.broadcast %cst_35 : f32 to vector<32x128xf32>
    %54 = arith.maximumf %52, %53 : vector<32x128xf32>
    %55 = arith.maximumf %45, %54 : vector<32x128xf32>
    %c5 = arith.constant 5 : index
    %c0_36 = arith.constant 0 : index
    %c0_37 = arith.constant 0 : index
    %56 = vector.load %arg2[%c5, %c0_36, %c0_37] : memref<8x9x128xbf16, #tpu.memory_space<vmem>>, vector<1x9x128xbf16>
    %57 = vector.shape_cast %56 : vector<1x9x128xbf16> to vector<9x128xbf16>
    %cst_38 = arith.constant dense<0.000000e+00> : vector<17x128xf32>
    %58 = tpu.matmul %3, %57, %cst_38 {dimension_numbers = #tpu.dot_dimension_numbers<[1], [0], [0], [1], [0, 0, 1, 1], [], []>} : vector<17x9xbf16>, vector<9x128xbf16>, vector<17x128xf32> -> vector<17x128xf32>
    %cst_39 = arith.constant 0.000000e+00 : f32
    %59 = vector.broadcast %cst_39 : f32 to vector<17x128xf32>
    %60 = arith.maximumf %58, %59 : vector<17x128xf32>
    %61 = arith.truncf %60 : vector<17x128xf32> to vector<17x128xbf16>
    %cst_40 = arith.constant dense<0.000000e+00> : vector<32x128xf32>
    %62 = tpu.matmul %4, %61, %cst_40 {dimension_numbers = #tpu.dot_dimension_numbers<[1], [0], [0], [1], [0, 0, 1, 1], [], []>} : vector<32x17xbf16>, vector<17x128xbf16>, vector<32x128xf32> -> vector<32x128xf32>
    %cst_41 = arith.constant 0.000000e+00 : f32
    %63 = vector.broadcast %cst_41 : f32 to vector<32x128xf32>
    %64 = arith.maximumf %62, %63 : vector<32x128xf32>
    %65 = arith.maximumf %55, %64 : vector<32x128xf32>
    %c6 = arith.constant 6 : index
    %c0_42 = arith.constant 0 : index
    %c0_43 = arith.constant 0 : index
    %66 = vector.load %arg2[%c6, %c0_42, %c0_43] : memref<8x9x128xbf16, #tpu.memory_space<vmem>>, vector<1x9x128xbf16>
    %67 = vector.shape_cast %66 : vector<1x9x128xbf16> to vector<9x128xbf16>
    %cst_44 = arith.constant dense<0.000000e+00> : vector<17x128xf32>
    %68 = tpu.matmul %3, %67, %cst_44 {dimension_numbers = #tpu.dot_dimension_numbers<[1], [0], [0], [1], [0, 0, 1, 1], [], []>} : vector<17x9xbf16>, vector<9x128xbf16>, vector<17x128xf32> -> vector<17x128xf32>
    %cst_45 = arith.constant 0.000000e+00 : f32
    %69 = vector.broadcast %cst_45 : f32 to vector<17x128xf32>
    %70 = arith.maximumf %68, %69 : vector<17x128xf32>
    %71 = arith.truncf %70 : vector<17x128xf32> to vector<17x128xbf16>
    %cst_46 = arith.constant dense<0.000000e+00> : vector<32x128xf32>
    %72 = tpu.matmul %4, %71, %cst_46 {dimension_numbers = #tpu.dot_dimension_numbers<[1], [0], [0], [1], [0, 0, 1, 1], [], []>} : vector<32x17xbf16>, vector<17x128xbf16>, vector<32x128xf32> -> vector<32x128xf32>
    %cst_47 = arith.constant 0.000000e+00 : f32
    %73 = vector.broadcast %cst_47 : f32 to vector<32x128xf32>
    %74 = arith.maximumf %72, %73 : vector<32x128xf32>
    %75 = arith.maximumf %65, %74 : vector<32x128xf32>
    %c7 = arith.constant 7 : index
    %c0_48 = arith.constant 0 : index
    %c0_49 = arith.constant 0 : index
    %76 = vector.load %arg2[%c7, %c0_48, %c0_49] : memref<8x9x128xbf16, #tpu.memory_space<vmem>>, vector<1x9x128xbf16>
    %77 = vector.shape_cast %76 : vector<1x9x128xbf16> to vector<9x128xbf16>
    %cst_50 = arith.constant dense<0.000000e+00> : vector<17x128xf32>
    %78 = tpu.matmul %3, %77, %cst_50 {dimension_numbers = #tpu.dot_dimension_numbers<[1], [0], [0], [1], [0, 0, 1, 1], [], []>} : vector<17x9xbf16>, vector<9x128xbf16>, vector<17x128xf32> -> vector<17x128xf32>
    %cst_51 = arith.constant 0.000000e+00 : f32
    %79 = vector.broadcast %cst_51 : f32 to vector<17x128xf32>
    %80 = arith.maximumf %78, %79 : vector<17x128xf32>
    %81 = arith.truncf %80 : vector<17x128xf32> to vector<17x128xbf16>
    %cst_52 = arith.constant dense<0.000000e+00> : vector<32x128xf32>
    %82 = tpu.matmul %4, %81, %cst_52 {dimension_numbers = #tpu.dot_dimension_numbers<[1], [0], [0], [1], [0, 0, 1, 1], [], []>} : vector<32x17xbf16>, vector<17x128xbf16>, vector<32x128xf32> -> vector<32x128xf32>
    %cst_53 = arith.constant 0.000000e+00 : f32
    %83 = vector.broadcast %cst_53 : f32 to vector<32x128xf32>
    %84 = arith.maximumf %82, %83 : vector<32x128xf32>
    %85 = arith.maximumf %75, %84 : vector<32x128xf32>
    %c0_54 = arith.constant 0 : index
    %c0_55 = arith.constant 0 : index
    %86 = vector.load %arg5[%c0_54, %c0_55] : memref<32x128xf32, #tpu.memory_space<vmem>>, vector<32x128xf32>
    tpu.vector_store %arg5[%c0_54, %c0_55], %85 {strides = array<i32>} : memref<32x128xf32, #tpu.memory_space<vmem>>, vector<32x128xf32>,
    return
  }
  func.func @transform_0(%arg0: i32, %arg1: i32) -> (i32, i32, i32) {
    %c0_i32 = arith.constant 0 : i32
    %c0_i32_0 = arith.constant 0 : i32
    return %arg1, %c0_i32, %arg0 : i32, i32, i32
  }
  func.func @transform_1(%arg0: i32, %arg1: i32) -> (i32, i32) {
    %c0_i32 = arith.constant 0 : i32
    %c0_i32_0 = arith.constant 0 : i32
    %c0_i32_1 = arith.constant 0 : i32
    return %c0_i32, %c0_i32_0 : i32, i32
  }
  func.func @transform_2(%arg0: i32, %arg1: i32) -> (i32, i32) {
    %c0_i32 = arith.constant 0 : i32
    %c0_i32_0 = arith.constant 0 : i32
    %c0_i32_1 = arith.constant 0 : i32
    return %c0_i32, %c0_i32_0 : i32, i32
  }
  func.func @transform_3(%arg0: i32, %arg1: i32) -> (i32, i32) {
    %c0_i32 = arith.constant 0 : i32
    %c0_i32_0 = arith.constant 0 : i32
    return %c0_i32, %arg0 : i32, i32
  }
}

</mosaic_0001>

<bundles_post_ra>
// kernel: tpu_custom_call.1
= control target key start
LH: loop header
LB: loop body
LE: loop exit
PB: predicated region body
PF: predicated region fallthrough
CT: control target
= control target key end

     0   :  { %vm57_vm0 = vcmask 1043456   ;;  %vm58_vm1 = vcmask 1044480   ;;  %v1353_v2 = vmov 65535   ;;  %vm50_vm2 = vcmask 72704   ;;  %s1488_s0 = inlined_call_operand.vmem [shape: bf16[8,9,128], index: 0, kind: input, shape index: {}]   ;;  %s1489_s1 = inlined_call_operand.vmem [shape: bf16[17,9], index: 1, kind: input, shape index: {}]   ;;  %s1490_s2 = inlined_call_operand.vmem [shape: bf16[32,17], index: 2, kind: input, shape index: {}]   ;;  %s1491_s3 = inlined_call_operand.hbm [shape: f32[32,128], index: 3, kind: output, shape index: {}]  }
   0x1   :  { %v1317_v0 = vld [vmem:[%s1488_s0] sm:$0x1f]   ;;  %v59_v3 = vsel %vm57_vm0, 4294967295, %v1353_v2  ;;  %v1319_v6 = vld [vmem:[%s1489_s1 + $0x8] ss:$0 sps:$4 sm:$0x11]  }
   0x2   :  { %v1318_v1 = vld [vmem:[%s1489_s1] sm:$0xff]   ;;  %v60_v4 = vsel %vm58_vm1, %v59_v3, 0  ;;  %v1320_v7 = vld [vmem:[%s1488_s0 + $0x8] sm:$0x1f]   ;;  %v1321_v8 = vld [vmem:[%s1488_s0 + $0x10] sm:$0x1f]  }
   0x3   :  { %1201 = vmatprep.mubr.msk.bf16.mxu0 %vm50_vm2, %v1318_v1  ;;  %v62_v5 = vand.u32 %v1317_v0, %v60_v4  ;;  %v206_v9 = vand.u32 %v1320_v7, %v60_v4  ;;  %v330_v10 = vand.u32 %v1321_v8, %v60_v4  ;;  %v1322_v11 = vld [vmem:[%s1488_s0 + $0x18] sm:$0x1f]  }
   0x5   :  { %1199 = vmatprep.subr.bf16.mxu0 %v62_v5 }
   0x6   :  { %1200 = vmatpush3.bf16.msra.mxu0 %v62_v5 }
   0x7   :  { %1213 = vmatprep.subr.bf16.mxu0 %v206_v9 }
   0x9   :  { %1202 = vmatmul.mubr.msk.bf16.vlgmr.msra.gmra.mrb[0].mxu0 %vm50_vm2, %v1319_v6 }
   0xa   :  { %1214 = vmatpush3.bf16.msra.mxu0 %v206_v9  ;;  %1215 = vmatprep.mubr.msk.bf16.mxu0 %vm50_vm2, %v1318_v1 }
   0xb   :  { %1227 = vmatprep.subr.bf16.mxu0 %v330_v10 }
   0xc   :  { %8 = vsyncpa [#allocation3], 0  ;;  %v454_v12 = vand.u32 %v1322_v11, %v60_v4  ;;  %v1323_v13 = vld [vmem:[%s1488_s0 + $0x20] sm:$0x1f]   ;;  %v1324_v15 = vld [vmem:[%s1488_s0 + $0x28] sm:$0x1f]  }
   0xd   :  { %v578_v14 = vand.u32 %v1323_v13, %v60_v4  ;;  %v702_v16 = vand.u32 %v1324_v15, %v60_v4  ;;  %v1325_v17 = vld [vmem:[%s1488_s0 + $0x30] sm:$0x1f]   ;;  %v1326_v19 = vld [vmem:[%s1488_s0 + $0x38] sm:$0x1f]   ;;  %v1427_v21 = vld [vmem:[%s1490_s2] sm:$0xff]   ;;  %vm127_vm3 = vcmask 138240  }
   0xe   :  { %v826_v18 = vand.u32 %v1325_v17, %v60_v4  ;;  %v950_v20 = vand.u32 %v1326_v19, %v60_v4  ;;  %1209 = vmatprep.mubr.msk.bf16.mxu1 %vm127_vm3, %v1427_v21  ;;  %vm134_vm4 = vcmask 1040384   ;;  %v1354_v30 = vmov 0   ;;  %v1437_v42 = vld [vmem:[%s1490_s2 + $0x8] sm:$0xff]   ;;  %s1355_s2 = smov [#allocation2]  }
   0xf   :  { %v1431_v31 = vsel %vm134_vm4, 65535, %v1354_v30  ;;  %s1074_s7 = sshll.u32 %s1355_s2, 4  ;;  %s1075_s7 = int_to_ptr.vmem [resolvable:$true] %s1074_s7 }
  0x10   :  { %s1329_s8 = scalar_lea.vmem %s1075_s7, 512  ;;  %p1334_p1 = scmp.lt.s32.totalorder %s1075_s7, %s1075_s7 }
  0x11   :  { %1216 = vmatmul.mubr.msk.bf16.vlgmr.msra.gmra.mrb[4].mxu0 %vm50_vm2, %v1319_v6  ;;  %p1330_p0 = scmp.ne.s32.totalorder %s1075_s7, %s1329_s8  ;;  %p1335_p2 = scmp.lt.s32.totalorder %s1329_s8, %s1329_s8 }
  0x12   :  { %1228 = vmatpush3.bf16.msra.mxu0 %v330_v10  ;;  %1229 = vmatprep.mubr.msk.bf16.mxu0 %vm50_vm2, %v1318_v1 }
  0x13   :  { %1241 = vmatprep.subr.bf16.mxu0 %v454_v12  ;;  %p1336_p3 = por %p1335_p2, %p1334_p1 }
  0x15   :  { %p1337_p4 = pnand %p1336_p3, %p1330_p0 }
  0x19   :  { %1230 = vmatmul.mubr.msk.bf16.vlgmr.msra.gmra.mrb[8].mxu0 %vm50_vm2, %v1319_v6 }
  0x1a   :  { %1242 = vmatpush3.bf16.msra.mxu0 %v454_v12  ;;  %1243 = vmatprep.mubr.msk.bf16.mxu0 %vm50_vm2, %v1318_v1 }
  0x1b   :  { %1255 = vmatprep.subr.bf16.mxu0 %v578_v14 }
  0x21   :  { %1244 = vmatmul.mubr.msk.bf16.vlgmr.msra.gmra.mrb[12].mxu0 %vm50_vm2, %v1319_v6 }
  0x22   :  { %1256 = vmatpush3.bf16.msra.mxu0 %v578_v14  ;;  %1257 = vmatprep.mubr.msk.bf16.mxu0 %vm50_vm2, %v1318_v1 }
  0x23   :  { %1269 = vmatprep.subr.bf16.mxu0 %v702_v16 }
  0x29   :  { %1258 = vmatmul.mubr.msk.bf16.vlgmr.msra.gmra.mrb[16].mxu0 %vm50_vm2, %v1319_v6 }
  0x2a   :  { %1270 = vmatpush3.bf16.msra.mxu0 %v702_v16  ;;  %1271 = vmatprep.mubr.msk.bf16.mxu0 %vm50_vm2, %v1318_v1 }
  0x2b   :  { %1283 = vmatprep.subr.bf16.mxu0 %v826_v18 }
  0x31   :  { %1272 = vmatmul.mubr.msk.bf16.vlgmr.msra.gmra.mrb[20].mxu0 %vm50_vm2, %v1319_v6 }
  0x32   :  { %1284 = vmatpush3.bf16.msra.mxu0 %v826_v18  ;;  %1285 = vmatprep.mubr.msk.bf16.mxu0 %vm50_vm2, %v1318_v1 }
  0x33   :  { %1297 = vmatprep.subr.bf16.mxu0 %v950_v20 }
  0x39   :  { %1286 = vmatmul.mubr.msk.bf16.vlgmr.msra.gmra.mrb[24].mxu0 %vm50_vm2, %v1319_v6 }
  0x3a   :  { %1298 = vmatpush3.bf16.msra.mxu0 %v950_v20  ;;  %1299 = vmatprep.mubr.msk.bf16.mxu0 %vm50_vm2, %v1318_v1 }
  0x41   :  { %1300 = vmatmul.mubr.msk.bf16.vlgmr.msra.gmra.mrb[28].mxu0 %vm50_vm2, %v1319_v6 }
  0xdc   :  { %v1203_v22 = vpop.f32.mrb[0].mxu0 }
  0xdd   :  { %v114_v23 = vmax.f32 %v1203_v22, 0.0  ;;  %v98_v24 = vpop.f32.mrb[1].mxu0 }
  0xde   :  { %v1204_v25 = vpop.f32.mrb[2].mxu0  ;;  %v112_v28 = vmax.f32 %v98_v24, 0.0 }
  0xdf   :  { %v101_v26 = vpop.f32.mrb[3].mxu0  ;;  %v116_v27 = vpack.c.bf16 %v114_v23, %v114_v23 }
  0xe0   :  { %v113_v29 = vmax.f32 %v101_v26, 0.0 }
  0xe1   :  { %v138_v33 = vand.u32 %v1431_v31, %v116_v27 }
  0xe2   :  { %v115_v32 = vpack.c.bf16 %v113_v29, %v112_v28 }
  0xe4   :  { %1205 = vmatprep.subr.bf16.mxu1 %v115_v32  ;;  %v1217_v34 = vpop.f32.mrb[4].mxu0 }
  0xe5   :  { %v258_v35 = vmax.f32 %v1217_v34, 0.0  ;;  %1206 = vmatpush3.bf16.msra.mxu1 %v115_v32  ;;  %v242_v36 = vpop.f32.mrb[5].mxu0 }
  0xe6   :  { %1207 = vmatprep.subr.bf16.mxu1 %v138_v33  ;;  %v1218_v37 = vpop.f32.mrb[6].mxu0  ;;  %v256_v40 = vmax.f32 %v242_v36, 0.0 }
  0xe7   :  { %v245_v38 = vpop.f32.mrb[7].mxu0  ;;  %v260_v39 = vpack.c.bf16 %v258_v35, %v258_v35 }
  0xe8   :  { %v257_v41 = vmax.f32 %v245_v38, 0.0 }
  0xe9   :  { %1208 = vmatpush3.bf16.msra.mxu1 %v138_v33  ;;  %v262_v44 = vand.u32 %v260_v39, %v1431_v31 }
  0xea   :  { %v259_v43 = vpack.c.bf16 %v257_v41, %v256_v40 }
  0xec   :  { %1210 = vmatmul.mubr.msk.bf16.vlgmr.msra.gmra.mrb[0].mxu1 %vm127_vm3, %v1437_v42  ;;  %1219 = vmatprep.subr.bf16.mxu1 %v259_v43  ;;  %v1231_v45 = vpop.f32.mrb[8].mxu0 }
  0xed   :  { %v382_v46 = vmax.f32 %v1231_v45, 0.0  ;;  %1220 = vmatpush3.bf16.msra.mxu1 %v259_v43  ;;  %v366_v47 = vpop.f32.mrb[9].mxu0  ;;  %1223 = vmatprep.mubr.msk.bf16.mxu1 %vm127_vm3, %v1427_v21 }
  0xee   :  { %1221 = vmatprep.subr.bf16.mxu1 %v262_v44  ;;  %v1232_v48 = vpop.f32.mrb[10].mxu0  ;;  %v380_v51 = vmax.f32 %v366_v47, 0.0 }
  0xef   :  { %v369_v49 = vpop.f32.mrb[11].mxu0  ;;  %v384_v50 = vpack.c.bf16 %v382_v46, %v382_v46 }
  0xf0   :  { %v381_v52 = vmax.f32 %v369_v49, 0.0 }
  0xf1   :  { %1222 = vmatpush3.bf16.msra.mxu1 %v262_v44  ;;  %v386_v54 = vand.u32 %v384_v50, %v1431_v31 }
  0xf2   :  { %v383_v53 = vpack.c.bf16 %v381_v52, %v380_v51 }
  0xf4   :  { %1224 = vmatmul.mubr.msk.bf16.vlgmr.msra.gmra.mrb[4].mxu1 %vm127_vm3, %v1437_v42  ;;  %1233 = vmatprep.subr.bf16.mxu1 %v383_v53  ;;  %v1245_v55 = vpop.f32.mrb[12].mxu0 }
  0xf5   :  { %v506_v56 = vmax.f32 %v1245_v55, 0.0  ;;  %1234 = vmatpush3.bf16.msra.mxu1 %v383_v53  ;;  %v490_v57 = vpop.f32.mrb[13].mxu0  ;;  %1237 = vmatprep.mubr.msk.bf16.mxu1 %vm127_vm3, %v1427_v21 }
  0xf6   :  { %1235 = vmatprep.subr.bf16.mxu1 %v386_v54  ;;  %v1246_v58 = vpop.f32.mrb[14].mxu0  ;;  %v504_v61 = vmax.f32 %v490_v57, 0.0 }
  0xf7   :  { %v493_v59 = vpop.f32.mrb[15].mxu0  ;;  %v508_v60 = vpack.c.bf16 %v506_v56, %v506_v56 }
  0xf8   :  { %v505_v62 = vmax.f32 %v493_v59, 0.0 }
  0xf9   :  { %1236 = vmatpush3.bf16.msra.mxu1 %v386_v54  ;;  %v510_v0 = vand.u32 %v508_v60, %v1431_v31 }
  0xfa   :  { %v507_v63 = vpack.c.bf16 %v505_v62, %v504_v61 }
  0xfc   :  { %1238 = vmatmul.mubr.msk.bf16.vlgmr.msra.gmra.mrb[8].mxu1 %vm127_vm3, %v1437_v42  ;;  %1247 = vmatprep.subr.bf16.mxu1 %v507_v63  ;;  %v1259_v1 = vpop.f32.mrb[16].mxu0 }
  0xfd   :  { %v630_v2 = vmax.f32 %v1259_v1, 0.0  ;;  %1248 = vmatpush3.bf16.msra.mxu1 %v507_v63  ;;  %v614_v3 = vpop.f32.mrb[17].mxu0  ;;  %1251 = vmatprep.mubr.msk.bf16.mxu1 %vm127_vm3, %v1427_v21 }
  0xfe   :  { %1249 = vmatprep.subr.bf16.mxu1 %v510_v0  ;;  %v1260_v4 = vpop.f32.mrb[18].mxu0  ;;  %v628_v7 = vmax.f32 %v614_v3, 0.0 }
  0xff   :  { %v617_v5 = vpop.f32.mrb[19].mxu0  ;;  %v632_v6 = vpack.c.bf16 %v630_v2, %v630_v2 }
 0x100   :  { %v629_v8 = vmax.f32 %v617_v5, 0.0 }
 0x101   :  { %1250 = vmatpush3.bf16.msra.mxu1 %v510_v0  ;;  %v634_v10 = vand.u32 %v632_v6, %v1431_v31 }
 0x102   :  { %v631_v9 = vpack.c.bf16 %v629_v8, %v628_v7 }
 0x104   :  { %1252 = vmatmul.mubr.msk.bf16.vlgmr.msra.gmra.mrb[12].mxu1 %vm127_vm3, %v1437_v42  ;;  %1261 = vmatprep.subr.bf16.mxu1 %v631_v9  ;;  %v1273_v11 = vpop.f32.mrb[20].mxu0 }
 0x105   :  { %v754_v12 = vmax.f32 %v1273_v11, 0.0  ;;  %1262 = vmatpush3.bf16.msra.mxu1 %v631_v9  ;;  %v738_v13 = vpop.f32.mrb[21].mxu0  ;;  %1265 = vmatprep.mubr.msk.bf16.mxu1 %vm127_vm3, %v1427_v21 }
 0x106   :  { %1263 = vmatprep.subr.bf16.mxu1 %v634_v10  ;;  %v1274_v14 = vpop.f32.mrb[22].mxu0  ;;  %v752_v17 = vmax.f32 %v738_v13, 0.0 }
 0x107   :  { %v741_v15 = vpop.f32.mrb[23].mxu0  ;;  %v756_v16 = vpack.c.bf16 %v754_v12, %v754_v12 }
 0x108   :  { %v753_v18 = vmax.f32 %v741_v15, 0.0 }
 0x109   :  { %1264 = vmatpush3.bf16.msra.mxu1 %v634_v10  ;;  %v758_v20 = vand.u32 %v756_v16, %v1431_v31 }
 0x10a   :  { %v755_v19 = vpack.c.bf16 %v753_v18, %v752_v17 }
 0x10c   :  { %1266 = vmatmul.mubr.msk.bf16.vlgmr.msra.gmra.mrb[16].mxu1 %vm127_vm3, %v1437_v42  ;;  %1275 = vmatprep.subr.bf16.mxu1 %v755_v19  ;;  %v1287_v22 = vpop.f32.mrb[24].mxu0 }
 0x10d   :  { %v878_v23 = vmax.f32 %v1287_v22, 0.0  ;;  %1276 = vmatpush3.bf16.msra.mxu1 %v755_v19  ;;  %v862_v24 = vpop.f32.mrb[25].mxu0  ;;  %1279 = vmatprep.mubr.msk.bf16.mxu1 %vm127_vm3, %v1427_v21 }
 0x10e   :  { %1277 = vmatprep.subr.bf16.mxu1 %v758_v20  ;;  %v1288_v25 = vpop.f32.mrb[26].mxu0  ;;  %v876_v28 = vmax.f32 %v862_v24, 0.0 }
 0x10f   :  { %v865_v26 = vpop.f32.mrb[27].mxu0  ;;  %v880_v27 = vpack.c.bf16 %v878_v23, %v878_v23 }
 0x110   :  { %v877_v29 = vmax.f32 %v865_v26, 0.0 }
 0x111   :  { %1278 = vmatpush3.bf16.msra.mxu1 %v758_v20  ;;  %v882_v32 = vand.u32 %v880_v27, %v1431_v31 }
 0x112   :  { %v879_v30 = vpack.c.bf16 %v877_v29, %v876_v28 }
 0x114   :  { %1280 = vmatmul.mubr.msk.bf16.vlgmr.msra.gmra.mrb[20].mxu1 %vm127_vm3, %v1437_v42  ;;  %1289 = vmatprep.subr.bf16.mxu1 %v879_v30  ;;  %v1301_v33 = vpop.f32.mrb[28].mxu0 }
 0x115   :  { %v1002_v34 = vmax.f32 %v1301_v33, 0.0  ;;  %1290 = vmatpush3.bf16.msra.mxu1 %v879_v30  ;;  %v986_v35 = vpop.f32.mrb[29].mxu0  ;;  %1293 = vmatprep.mubr.msk.bf16.mxu1 %vm127_vm3, %v1427_v21 }
 0x116   :  { %1291 = vmatprep.subr.bf16.mxu1 %v882_v32  ;;  %v1302_v36 = vpop.f32.mrb[30].mxu0  ;;  %v1000_v39 = vmax.f32 %v986_v35, 0.0 }
 0x117   :  { %v989_v37 = vpop.f32.mrb[31].mxu0  ;;  %v1004_v38 = vpack.c.bf16 %v1002_v34, %v1002_v34 }
 0x118   :  { %v1001_v40 = vmax.f32 %v989_v37, 0.0 }
 0x119   :  { %1292 = vmatpush3.bf16.msra.mxu1 %v882_v32  ;;  %v1006_v43 = vand.u32 %v1004_v38, %v1431_v31 }
 0x11a   :  { %v1003_v41 = vpack.c.bf16 %v1001_v40, %v1000_v39 }
 0x11c   :  { %1294 = vmatmul.mubr.msk.bf16.vlgmr.msra.gmra.mrb[24].mxu1 %vm127_vm3, %v1437_v42  ;;  %1303 = vmatprep.subr.bf16.mxu1 %v1003_v41 }
 0x11d   :  { %1304 = vmatpush3.bf16.msra.mxu1 %v1003_v41  ;;  %1307 = vmatprep.mubr.msk.bf16.mxu1 %vm127_vm3, %v1427_v21 }
 0x11e   :  { %1305 = vmatprep.subr.bf16.mxu1 %v1006_v43 }
 0x121   :  { %1306 = vmatpush3.bf16.msra.mxu1 %v1006_v43 }
 0x124   :  { %1308 = vmatmul.mubr.msk.bf16.vlgmr.msra.gmra.mrb[28].mxu1 %vm127_vm3, %v1437_v42 }
 0x1bf   :  { %v1211_v44 = vpop.f32.mrb[0].mxu1 }
 0x1c0   :  { %v174_v45 = vpop.f32.mrb[1].mxu1  ;;  %v191_v48 = vmax.f32 %v1211_v44, 0.0 }
 0x1c1   :  { %v1212_v46 = vpop.f32.mrb[2].mxu1  ;;  %v189_v49 = vmax.f32 %v174_v45, 0.0 }
 0x1c2   :  { %v177_v47 = vpop.f32.mrb[3].mxu1  ;;  %v192_v31 = vmax.f32 %v1212_v46, 0.0  ;;  %v195_v52 = vmax.f32 %v191_v48, 0.0 }
 0x1c3   :  { %v190_v50 = vmax.f32 %v177_v47, 0.0  ;;  %v193_v55 = vmax.f32 %v189_v49, 0.0 }
 0x1c4   :  { %v196_v57 = vmax.f32 %v192_v31, 0.0 }
 0x1c5   :  { %v194_v42 = vmax.f32 %v190_v50, 0.0 }
 0x1c7   :  { %v1225_v51 = vpop.f32.mrb[4].mxu1 }
 0x1c8   :  { %v315_v53 = vmax.f32 %v1225_v51, 0.0  ;;  %v298_v54 = vpop.f32.mrb[5].mxu1 }
 0x1c9   :  { %v313_v56 = vmax.f32 %v298_v54, 0.0  ;;  %v1226_v21 = vpop.f32.mrb[6].mxu1 }
 0x1ca   :  { %v319_v58 = vmax.f32 %v195_v52, %v315_v53  ;;  %v316_v59 = vmax.f32 %v1226_v21, 0.0  ;;  %v301_v60 = vpop.f32.mrb[7].mxu1 }
 0x1cb   :  { %v317_v61 = vmax.f32 %v193_v55, %v313_v56  ;;  %v314_v62 = vmax.f32 %v301_v60, 0.0 }
 0x1cc   :  { %v320_v63 = vmax.f32 %v196_v57, %v316_v59 }
 0x1cd   :  { %v318_v0 = vmax.f32 %v194_v42, %v314_v62 }
 0x1cf   :  { %v1239_v1 = vpop.f32.mrb[8].mxu1 }
 0x1d0   :  { %v439_v2 = vmax.f32 %v1239_v1, 0.0  ;;  %v422_v3 = vpop.f32.mrb[9].mxu1 }
 0x1d1   :  { %v437_v4 = vmax.f32 %v422_v3, 0.0  ;;  %v1240_v5 = vpop.f32.mrb[10].mxu1 }
 0x1d2   :  { %v443_v6 = vmax.f32 %v319_v58, %v439_v2  ;;  %v440_v7 = vmax.f32 %v1240_v5, 0.0  ;;  %v425_v8 = vpop.f32.mrb[11].mxu1 }
 0x1d3   :  { %v441_v9 = vmax.f32 %v317_v61, %v437_v4  ;;  %v438_v10 = vmax.f32 %v425_v8, 0.0 }
 0x1d4   :  { %v444_v11 = vmax.f32 %v320_v63, %v440_v7 }
 0x1d5   :  { %v442_v12 = vmax.f32 %v318_v0, %v438_v10 }
 0x1d7   :  { %v1253_v13 = vpop.f32.mrb[12].mxu1 }
 0x1d8   :  { %v563_v14 = vmax.f32 %v1253_v13, 0.0  ;;  %v546_v15 = vpop.f32.mrb[13].mxu1 }
 0x1d9   :  { %v561_v16 = vmax.f32 %v546_v15, 0.0  ;;  %v1254_v17 = vpop.f32.mrb[14].mxu1 }
 0x1da   :  { %v567_v18 = vmax.f32 %v443_v6, %v563_v14  ;;  %v564_v19 = vmax.f32 %v1254_v17, 0.0  ;;  %v549_v20 = vpop.f32.mrb[15].mxu1 }
 0x1db   :  { %v565_v22 = vmax.f32 %v441_v9, %v561_v16  ;;  %v562_v23 = vmax.f32 %v549_v20, 0.0 }
 0x1dc   :  { %v568_v24 = vmax.f32 %v444_v11, %v564_v19 }
 0x1dd   :  { %v566_v25 = vmax.f32 %v442_v12, %v562_v23 }
 0x1df   :  { %v1267_v26 = vpop.f32.mrb[16].mxu1 }
 0x1e0   :  { %v687_v27 = vmax.f32 %v1267_v26, 0.0  ;;  %v670_v28 = vpop.f32.mrb[17].mxu1 }
 0x1e1   :  { %v685_v29 = vmax.f32 %v670_v28, 0.0  ;;  %v1268_v30 = vpop.f32.mrb[18].mxu1 }
 0x1e2   :  { %v691_v32 = vmax.f32 %v567_v18, %v687_v27  ;;  %v688_v33 = vmax.f32 %v1268_v30, 0.0  ;;  %v673_v34 = vpop.f32.mrb[19].mxu1 }
 0x1e3   :  { %v689_v35 = vmax.f32 %v565_v22, %v685_v29  ;;  %v686_v36 = vmax.f32 %v673_v34, 0.0 }
 0x1e4   :  { %v692_v37 = vmax.f32 %v568_v24, %v688_v33 }
 0x1e5   :  { %v690_v38 = vmax.f32 %v566_v25, %v686_v36 }
 0x1e7   :  { %v1281_v39 = vpop.f32.mrb[20].mxu1 }
 0x1e8   :  { %v811_v40 = vmax.f32 %v1281_v39, 0.0  ;;  %v794_v41 = vpop.f32.mrb[21].mxu1 }
 0x1e9   :  { %v809_v43 = vmax.f32 %v794_v41, 0.0  ;;  %v1282_v44 = vpop.f32.mrb[22].mxu1 }
 0x1ea   :  { %v815_v45 = vmax.f32 %v691_v32, %v811_v40  ;;  %v812_v46 = vmax.f32 %v1282_v44, 0.0  ;;  %v797_v47 = vpop.f32.mrb[23].mxu1 }
 0x1eb   :  { %v813_v48 = vmax.f32 %v689_v35, %v809_v43  ;;  %v810_v49 = vmax.f32 %v797_v47, 0.0 }
 0x1ec   :  { %v816_v31 = vmax.f32 %v692_v37, %v812_v46 }
 0x1ed   :  { %v814_v50 = vmax.f32 %v690_v38, %v810_v49 }
 0x1ef   :  { %v1295_v51 = vpop.f32.mrb[24].mxu1 }
 0x1f0   :  { %v935_v52 = vmax.f32 %v1295_v51, 0.0  ;;  %v918_v53 = vpop.f32.mrb[25].mxu1 }
 0x1f1   :  { %v933_v54 = vmax.f32 %v918_v53, 0.0  ;;  %v1296_v55 = vpop.f32.mrb[26].mxu1 }
 0x1f2   :  { %v939_v56 = vmax.f32 %v815_v45, %v935_v52  ;;  %v936_v21 = vmax.f32 %v1296_v55, 0.0  ;;  %v921_v57 = vpop.f32.mrb[27].mxu1 }
 0x1f3   :  { %v937_v58 = vmax.f32 %v813_v48, %v933_v54  ;;  %v934_v59 = vmax.f32 %v921_v57, 0.0 }
 0x1f4   :  { %v940_v60 = vmax.f32 %v816_v31, %v936_v21 }
 0x1f5   :  { %v938_v42 = vmax.f32 %v814_v50, %v934_v59 }
 0x1f7   :  { %v1309_v61 = vpop.f32.mrb[28].mxu1 }
 0x1f8   :  { %v1059_v62 = vmax.f32 %v1309_v61, 0.0  ;;  %v1042_v63 = vpop.f32.mrb[29].mxu1 }
 0x1f9   :  { %v1057_v0 = vmax.f32 %v1042_v63, 0.0  ;;  %v1310_v1 = vpop.f32.mrb[30].mxu1 }
 0x1fa   :  { %v1063_v2 = vmax.f32 %v939_v56, %v1059_v62  ;;  %v1060_v3 = vmax.f32 %v1310_v1, 0.0  ;;  %v1045_v4 = vpop.f32.mrb[31].mxu1 }
 0x1fb   :  { %v1061_v5 = vmax.f32 %v937_v58, %v1057_v0  ;;  %v1058_v6 = vmax.f32 %v1045_v4, 0.0 }
 0x1fc   :  { %1067 = vst [vmem:[#allocation2 + $0x10] sm:$0xff] %v1063_v2  ;;  %v1064_v7 = vmax.f32 %v940_v60, %v1060_v3 }
 0x1fd   :  { %1065 = vst [vmem:[#allocation2] sm:$0xff] %v1061_v5  ;;  %v1062_v8 = vmax.f32 %v938_v42, %v1058_v6 }
 0x1fe   :  { %1068 = vst [vmem:[#allocation2 + $0x18] sm:$0xff] %v1064_v7 }
 0x1ff   :  { %1066 = vst [vmem:[#allocation2 + $0x8] sm:$0xff] %v1062_v8 }
 0x200   :  { %1340 = shalt.err (!%p1337_p4)
}
 0x201   :  { %s1341_s11 = scalar_lea.hbm %s1491_s3, 512 }
 0x202   :  { %p1342_p5 = scmp.ne.s32.totalorder %s1491_s3, %s1341_s11  ;;  %p1345_p6 = scmp.lt.u32.totalorder %s1341_s11, %s1491_s3 }
 0x204   :  { %p1347_p7 = pnand %p1345_p6, %p1342_p5 }
 0x206   :  { %1350 = shalt.err (!%p1347_p7)
}
 0x207   :  { %s1356_s16 = smov 128   ;;  %s1357_s17 = smov 8  }
 0x208   :  { %1080 = dma.vmem_to_hbm [thread:$0]  %s1075_s7, 512, %s1491_s3, [#allocation3], %s1356_s16, %s1356_s16, %s1357_s17  }
 0x209   :  { %1351 = dma.done.wait [#allocation3], 512  }
 0x20a   :  { %1352 = vsyncadd [#allocation3], 4294966784 }
 0x20b   :  { %1084 = vsyncpa [#allocation3], 1 }

</bundles_post_ra>
